<compile_context>
chip_gen: v7x
topology: tpu7x:2x2x1
jax: 0.10.0
libtpu: 0.0.40
codegen_flags: <defaults>
</compile_context>

<pallas_src>
import functools

import jax
import jax.numpy as jnp
from jax.experimental import pallas as pl
from jax.experimental.pallas import tpu as pltpu

ACTION_DIM = 3
HIDDEN_LAYER = 70
STATE_DIM = 8  # stand-in for len(TradingEnv().reset()); small deterministic value

LANE = 128
HIDDEN_PAD = LANE        # hidden dim padded 70 -> 128 (clean MXU/VPU tiles)
OUT_PAD = 8              # output dim padded 3 -> 8 (full-dim block; 16x less writeback than 128)
DEFAULT_TB = 4096        # batch tile; sweep 2048-8192 for the last few %
PALLAS_MIN_BATCH = 256   # below this, plain XLA beats the pallas_call fixed cost


def _round_up(n, m):
    return (n + m - 1) // m * m


def qnetwork_kernel(x_ref, w1_ref, b1_ref, w2_ref, b2_ref, w3_ref, b3_ref, out_ref):
    """Fused MLP on one batch tile: relu(x@W1+b1) -> relu(.@W2+b2) -> .@W3+b3.

    Matmuls run the MXU with bf16 operands and f32 accumulation; bias add / ReLU
    stay in f32 on the accumulator.
    """
    bf16 = jnp.bfloat16
    x = x_ref[...].astype(bf16)
    h1 = jnp.dot(x, w1_ref[...], preferred_element_type=jnp.float32) + b1_ref[...]
    h1 = jnp.maximum(h1, 0.0)
    h2 = jnp.dot(h1.astype(bf16), w2_ref[...], preferred_element_type=jnp.float32) + b2_ref[...]
    h2 = jnp.maximum(h2, 0.0)
    q = jnp.dot(h2.astype(bf16), w3_ref[...], preferred_element_type=jnp.float32) + b3_ref[...]
    out_ref[...] = q.astype(out_ref.dtype)


def _pad_params(params):
    """Zero-pad hidden/output dims. Weights stored bf16 (MXU-native), biases f32."""
    bf16 = jnp.bfloat16
    w1 = jnp.zeros((STATE_DIM, HIDDEN_PAD), jnp.float32).at[:, :HIDDEN_LAYER].set(params["w1"]).astype(bf16)
    b1 = jnp.zeros((1, HIDDEN_PAD), jnp.float32).at[:, :HIDDEN_LAYER].set(params["b1"])
    w2 = jnp.zeros((HIDDEN_PAD, HIDDEN_PAD), jnp.float32).at[:HIDDEN_LAYER, :HIDDEN_LAYER].set(params["w2"]).astype(bf16)
    b2 = jnp.zeros((1, HIDDEN_PAD), jnp.float32).at[:, :HIDDEN_LAYER].set(params["b2"])
    w3 = jnp.zeros((HIDDEN_PAD, OUT_PAD), jnp.float32).at[:HIDDEN_LAYER, :ACTION_DIM].set(params["w3"]).astype(bf16)
    b3 = jnp.zeros((1, OUT_PAD), jnp.float32).at[:, :ACTION_DIM].set(params["b3"])
    return w1, b1, w2, b2, w3, b3


@functools.partial(jax.jit, static_argnames=("tb",))
def qnetwork_forward(x, params, tb=DEFAULT_TB):
    """Fused QNetwork MLP Pallas kernel.

    x: (B, STATE_DIM) float32
    params: dict with w1 (S,70), b1 (1,70), w2 (70,70), b2 (1,70), w3 (70,3), b3 (1,3)
    returns: (B, ACTION_DIM) float32 Q-values
    """
    # TODO(synk): the torch.isnan assert in forward() is a host-side check; not
    # reproduced inside the traced kernel.
    B = x.shape[0]
    w1, b1, w2, b2, w3, b3 = _pad_params(params)

    # Batch tile: multiple of 8 sublanes, capped at `tb`. No host-side jnp.pad:
    # a ragged trailing block reads unspecified OOB rows (rows are independent
    # through the MLP) and Pallas drops their output rows on writeback.
    TB = min(tb, _round_up(B, 8))
    if B >= 16:
        # Guarantee >= 2 grid steps so the "parallel" axis feeds both v7x TensorCores.
        TB = min(TB, _round_up(pl.cdiv(B, 2), 8))
    grid = (pl.cdiv(B, TB),)

    # Weights/biases: full-array blocks with a constant index_map -> VMEM-resident
    # across all grid steps (fetched once, ~70 KiB padded total).
    const = lambda a: pl.BlockSpec(a.shape, lambda i: (0,) * a.ndim)

    out_padded = pl.pallas_call(
        qnetwork_kernel,
        out_shape=jax.ShapeDtypeStruct((B, OUT_PAD), jnp.float32),
        grid=grid,
        in_specs=[
            pl.BlockSpec((TB, STATE_DIM), lambda i: (i, 0)),   # x: tiled over batch
            const(w1), const(b1), const(w2), const(b2), const(w3), const(b3),
        ],
        out_specs=pl.BlockSpec((TB, OUT_PAD), lambda i: (i, 0)),  # 8-lane output tile
        compiler_params=pltpu.CompilerParams(
            dimension_semantics=("parallel",),          # shard batch across TCs on v7x
            vmem_limit_bytes=32 * 1024 * 1024,
        ),
    )(x, w1, b1, w2, b2, w3, b3)

    return out_padded[:, :ACTION_DIM]


def qnetwork_apply(x, params):
    """Dispatcher: tiny batches (single-step action selection) bypass the kernel."""
    if x.shape[0] < PALLAS_MIN_BATCH:
        return qnetwork_reference(x, params)
    return qnetwork_forward(x, params)


def init_params(key):
    """Deterministic init mimicking nn.Linear's U(-1/sqrt(fan_in), 1/sqrt(fan_in))."""
    def linear(key, fan_in, fan_out):
        kw, kb = jax.random.split(key)
        bound = 1.0 / jnp.sqrt(jnp.float32(fan_in))
        w = jax.random.uniform(kw, (fan_in, fan_out), jnp.float32, -bound, bound)
        b = jax.random.uniform(kb, (1, fan_out), jnp.float32, -bound, bound)
        return w, b

    k1, k2, k3 = jax.random.split(key, 3)
    w1, b1 = linear(k1, STATE_DIM, HIDDEN_LAYER)
    w2, b2 = linear(k2, HIDDEN_LAYER, HIDDEN_LAYER)
    w3, b3 = linear(k3, HIDDEN_LAYER, ACTION_DIM)
    return {"w1": w1, "b1": b1, "w2": w2, "b2": b2, "w3": w3, "b3": b3}


def qnetwork_reference(x, p):
    """Pure-JAX f32 reference (matches the PyTorch module's numerics)."""
    h1 = jnp.maximum(x @ p["w1"] + p["b1"], 0.0)
    h2 = jnp.maximum(h1 @ p["w2"] + p["b2"], 0.0)
    return h2 @ p["w3"] + p["b3"]


def qnetwork_reference_bf16(x, p):
    """Pure-JAX reference matching the kernel's bf16-operand / f32-accumulate numerics."""
    bf16, f32 = jnp.bfloat16, jnp.float32
    h1 = jnp.maximum(jnp.dot(x.astype(bf16), p["w1"].astype(bf16), preferred_element_type=f32) + p["b1"], 0.0)
    h2 = jnp.maximum(jnp.dot(h1.astype(bf16), p["w2"].astype(bf16), preferred_element_type=f32) + p["b2"], 0.0)
    return jnp.dot(h2.astype(bf16), p["w3"].astype(bf16), preferred_element_type=f32) + p["b3"]


def _check(name, x, params):
    q = jax.block_until_ready(qnetwork_forward(x, params))
    assert q.shape == (x.shape[0], ACTION_DIM), f"{name}: bad shape {q.shape}"
    q_bf = qnetwork_reference_bf16(x, params)
    q_f32 = qnetwork_reference(x, params)
    err_bf = jnp.max(jnp.abs(q - q_bf))
    err_f32 = jnp.max(jnp.abs(q - q_f32))
    assert jnp.allclose(q, q_bf, atol=2e-3, rtol=2e-3), f"{name}: bf16-ref mismatch, max abs err {err_bf}"
    assert jnp.allclose(q, q_f32, atol=1e-1, rtol=1e-1), f"{name}: f32-ref mismatch, max abs err {err_f32}"
    return q


if __name__ == "__main__":
    key = jax.random.PRNGKey(0)
    kx, kp, kx2 = jax.random.split(key, 3)
    params = init_params(kp)

    # Small batch: single grid step.
    x_small = jax.random.normal(kx, (8, STATE_DIM), dtype=jnp.float32)
    _check("small", x_small, params)

    # Larger batch, not tile-aligned: exercises the 2-step "parallel" grid (v7x megacore)
    # and the ragged trailing block (no host-side jnp.pad).
    x_big = jax.random.normal(kx2, (1037, STATE_DIM), dtype=jnp.float32)
    _check("big", x_big, params)

    # Dispatcher sanity (small batch goes through plain XLA).
    q_disp = jax.block_until_ready(qnetwork_apply(x_small, params))
    assert q_disp.shape == (8, ACTION_DIM)

    print("KERNEL_OK")
</pallas_src>

<mosaic_0001>
module attributes {stable_mosaic.version = 11 : i64} {
  func.func @qnetwork_kernel(%arg0: i32, %arg1: memref<8x8xf32, #tpu.memory_space<vmem>>, %arg2: memref<8x128xbf16, #tpu.memory_space<vmem>>, %arg3: memref<1x128xf32, #tpu.memory_space<vmem>>, %arg4: memref<128x128xbf16, #tpu.memory_space<vmem>>, %arg5: memref<1x128xf32, #tpu.memory_space<vmem>>, %arg6: memref<128x8xbf16, #tpu.memory_space<vmem>>, %arg7: memref<1x8xf32, #tpu.memory_space<vmem>>, %arg8: memref<8x8xf32, #tpu.memory_space<vmem>>) attributes {dimension_semantics = [#tpu.dimension_semantics<parallel>], iteration_bounds = array<i64: 1>, scalar_prefetch = 0 : i64, scratch_operands = 0 : i64, tpu.core_type = #tpu.core_type<tc>, window_params = [{transform_indices = @transform_0, window_bounds = array<i64: 8, 8>}, {pipeline_mode = #tpu.pipeline_mode<synchronous>, transform_indices = @transform_1, window_bounds = array<i64: 8, 128>}, {pipeline_mode = #tpu.pipeline_mode<synchronous>, transform_indices = @transform_2, window_bounds = array<i64: 1, 128>}, {pipeline_mode = #tpu.pipeline_mode<synchronous>, transform_indices = @transform_3, window_bounds = array<i64: 128, 128>}, {pipeline_mode = #tpu.pipeline_mode<synchronous>, transform_indices = @transform_4, window_bounds = array<i64: 1, 128>}, {pipeline_mode = #tpu.pipeline_mode<synchronous>, transform_indices = @transform_5, window_bounds = array<i64: 128, 8>}, {pipeline_mode = #tpu.pipeline_mode<synchronous>, transform_indices = @transform_6, window_bounds = array<i64: 1, 8>}, {transform_indices = @transform_7, window_bounds = array<i64: 8, 8>}]} {
    %c0 = arith.constant 0 : index
    %c0_0 = arith.constant 0 : index
    %0 = vector.load %arg1[%c0, %c0_0] : memref<8x8xf32, #tpu.memory_space<vmem>>, vector<8x8xf32>
    %1 = arith.truncf %0 : vector<8x8xf32> to vector<8x8xbf16>
    %c0_1 = arith.constant 0 : index
    %c0_2 = arith.constant 0 : index
    %2 = vector.load %arg2[%c0_1, %c0_2] : memref<8x128xbf16, #tpu.memory_space<vmem>>, vector<8x128xbf16>
    %cst = arith.constant dense<0.000000e+00> : vector<8x128xf32>
    %3 = tpu.matmul %1, %2, %cst {dimension_numbers = #tpu.dot_dimension_numbers<[1], [0], [0], [1], [0, 0, 1, 1], [], []>} : vector<8x8xbf16>, vector<8x128xbf16>, vector<8x128xf32> -> vector<8x128xf32>
    %c0_3 = arith.constant 0 : index
    %c0_4 = arith.constant 0 : index
    %4 = vector.load %arg3[%c0_3, %c0_4] : memref<1x128xf32, #tpu.memory_space<vmem>>, vector<1x128xf32>
    %5 = vector.broadcast %4 : vector<1x128xf32> to vector<8x128xf32>
    %6 = arith.addf %3, %5 : vector<8x128xf32>
    %cst_5 = arith.constant 0.000000e+00 : f32
    %7 = vector.broadcast %cst_5 : f32 to vector<8x128xf32>
    %8 = arith.maximumf %6, %7 : vector<8x128xf32>
    %9 = arith.truncf %8 : vector<8x128xf32> to vector<8x128xbf16>
    %c0_6 = arith.constant 0 : index
    %c0_7 = arith.constant 0 : index
    %10 = vector.load %arg4[%c0_6, %c0_7] : memref<128x128xbf16, #tpu.memory_space<vmem>>, vector<128x128xbf16>
    %cst_8 = arith.constant dense<0.000000e+00> : vector<8x128xf32>
    %11 = tpu.matmul %9, %10, %cst_8 {dimension_numbers = #tpu.dot_dimension_numbers<[1], [0], [0], [1], [0, 0, 1, 1], [], []>} : vector<8x128xbf16>, vector<128x128xbf16>, vector<8x128xf32> -> vector<8x128xf32>
    %c0_9 = arith.constant 0 : index
    %c0_10 = arith.constant 0 : index
    %12 = vector.load %arg5[%c0_9, %c0_10] : memref<1x128xf32, #tpu.memory_space<vmem>>, vector<1x128xf32>
    %13 = vector.broadcast %12 : vector<1x128xf32> to vector<8x128xf32>
    %14 = arith.addf %11, %13 : vector<8x128xf32>
    %cst_11 = arith.constant 0.000000e+00 : f32
    %15 = vector.broadcast %cst_11 : f32 to vector<8x128xf32>
    %16 = arith.maximumf %14, %15 : vector<8x128xf32>
    %17 = arith.truncf %16 : vector<8x128xf32> to vector<8x128xbf16>
    %c0_12 = arith.constant 0 : index
    %c0_13 = arith.constant 0 : index
    %18 = vector.load %arg6[%c0_12, %c0_13] : memref<128x8xbf16, #tpu.memory_space<vmem>>, vector<128x8xbf16>
    %cst_14 = arith.constant dense<0.000000e+00> : vector<8x8xf32>
    %19 = tpu.matmul %17, %18, %cst_14 {dimension_numbers = #tpu.dot_dimension_numbers<[1], [0], [0], [1], [0, 0, 1, 1], [], []>} : vector<8x128xbf16>, vector<128x8xbf16>, vector<8x8xf32> -> vector<8x8xf32>
    %c0_15 = arith.constant 0 : index
    %c0_16 = arith.constant 0 : index
    %20 = vector.load %arg7[%c0_15, %c0_16] : memref<1x8xf32, #tpu.memory_space<vmem>>, vector<1x8xf32>
    %21 = vector.broadcast %20 : vector<1x8xf32> to vector<8x8xf32>
    %22 = arith.addf %19, %21 : vector<8x8xf32>
    %c0_17 = arith.constant 0 : index
    %c0_18 = arith.constant 0 : index
    %23 = vector.load %arg8[%c0_17, %c0_18] : memref<8x8xf32, #tpu.memory_space<vmem>>, vector<8x8xf32>
    tpu.vector_store %arg8[%c0_17, %c0_18], %22 {strides = array<i32>} : memref<8x8xf32, #tpu.memory_space<vmem>>, vector<8x8xf32>,
    return
  }
  func.func @transform_0(%arg0: i32) -> (i32, i32) {
    %c0_i32 = arith.constant 0 : i32
    %c0_i32_0 = arith.constant 0 : i32
    return %arg0, %c0_i32 : i32, i32
  }
  func.func @transform_1(%arg0: i32) -> (i32, i32) {
    %c0_i32 = arith.constant 0 : i32
    %c0_i32_0 = arith.constant 0 : i32
    %c0_i32_1 = arith.constant 0 : i32
    return %c0_i32, %c0_i32_0 : i32, i32
  }
  func.func @transform_2(%arg0: i32) -> (i32, i32) {
    %c0_i32 = arith.constant 0 : i32
    %c0_i32_0 = arith.constant 0 : i32
    %c0_i32_1 = arith.constant 0 : i32
    return %c0_i32, %c0_i32_0 : i32, i32
  }
  func.func @transform_3(%arg0: i32) -> (i32, i32) {
    %c0_i32 = arith.constant 0 : i32
    %c0_i32_0 = arith.constant 0 : i32
    %c0_i32_1 = arith.constant 0 : i32
    return %c0_i32, %c0_i32_0 : i32, i32
  }
  func.func @transform_4(%arg0: i32) -> (i32, i32) {
    %c0_i32 = arith.constant 0 : i32
    %c0_i32_0 = arith.constant 0 : i32
    %c0_i32_1 = arith.constant 0 : i32
    return %c0_i32, %c0_i32_0 : i32, i32
  }
  func.func @transform_5(%arg0: i32) -> (i32, i32) {
    %c0_i32 = arith.constant 0 : i32
    %c0_i32_0 = arith.constant 0 : i32
    %c0_i32_1 = arith.constant 0 : i32
    return %c0_i32, %c0_i32_0 : i32, i32
  }
  func.func @transform_6(%arg0: i32) -> (i32, i32) {
    %c0_i32 = arith.constant 0 : i32
    %c0_i32_0 = arith.constant 0 : i32
    %c0_i32_1 = arith.constant 0 : i32
    return %c0_i32, %c0_i32_0 : i32, i32
  }
  func.func @transform_7(%arg0: i32) -> (i32, i32) {
    %c0_i32 = arith.constant 0 : i32
    %c0_i32_0 = arith.constant 0 : i32
    return %arg0, %c0_i32 : i32, i32
  }
}

</mosaic_0001>

<bundles_post_ra>
// kernel: qnetwork_forward.1
= control target key start
LH: loop header
LB: loop body
LE: loop exit
PB: predicated region body
PF: predicated region fallthrough
CT: control target
= control target key end

     0   :  { %vm41_vm0 = vcmask 1043456   ;;  %v420_v0 = vmov 0.0   ;;  %vm421_vm1 = vmmov 0   ;;  %vm37_vm2 = vcmask 64512   ;;  %s553_s1 = inlined_call_operand.vmem [shape: bf16[8,128], index: 1, kind: input, shape index: {}]   ;;  %s554_s0 = inlined_call_operand.vmem [shape: f32[8,8], index: 0, kind: input, shape index: {}]   ;;  %s555_s3 = inlined_call_operand.vmem [shape: bf16[128,128], index: 3, kind: input, shape index: {}]   ;;  %s556_s5 = inlined_call_operand.vmem [shape: bf16[128,8], index: 5, kind: input, shape index: {}]   ;;  %s557_s2 = inlined_call_operand.vmem [shape: f32[1,128], index: 2, kind: input, shape index: {}]   ;;  %s558_s4 = inlined_call_operand.vmem [shape: f32[1,128], index: 4, kind: input, shape index: {}]   ;;  %s559_s6 = inlined_call_operand.vmem [shape: f32[1,8], index: 6, kind: input, shape index: {}]   ;;  %s560_s7 = inlined_call_operand.vmem [shape: f32[8,8], index: 7, kind: output, shape index: {}]  }
   0x1   :  { %356 = vmatprep.subr.bf16.mxu0 %v420_v0  ;;  %v29_v1 = vld [vmem:[%s553_s1] sm:$0xf]  ;;  %358 = vmatprep.mubr.msk.bf16.mxu0 %vm421_vm1, %v420_v0  ;;  %v405_v6 = vld [vmem:[%s555_s3 + $0x8] sm:$0xff]   ;;  %v406_v7 = vld [vmem:[%s555_s3 + $0x10] sm:$0xff]  }
   0x2   :  { %v27_v2 = vld [vmem:[%s554_s0] sm:$0xff]  ;;  %v43_v3 = vsel %vm41_vm0, %v29_v1, 0  ;;  %362 = vmatprep.subr.bf16.mxu1 %v420_v0  ;;  %378 = vmatprep.mubr.msk.bf16.mxu1 %vm421_vm1, %v420_v0  ;;  %v407_v8 = vld [vmem:[%s555_s3 + $0x18] sm:$0xff]   ;;  %v409_v10 = vld [vmem:[%s555_s3 + $0x28] sm:$0xff]  }
   0x3   :  { %v28_v4 = vpack.c.bf16 %v27_v2, %v27_v2  ;;  %v404_v5 = vld [vmem:[%s555_s3] sm:$0xff]   ;;  %357 = vmatpush3.bf16.msra.mxu0 %v43_v3  ;;  %v410_v11 = vld [vmem:[%s555_s3 + $0x30] sm:$0xff]   ;;  %v411_v12 = vld [vmem:[%s555_s3 + $0x38] sm:$0xff]  }
   0x4   :  { %363 = vmatpush3.bf16.msra.mxu1 %v404_v5  ;;  %382 = vmatprep.subr.bf16.mxu0 %v420_v0  ;;  %v408_v9 = vld [vmem:[%s555_s3 + $0x20] sm:$0xff]   ;;  %v413_v14 = vld [vmem:[%s556_s5 + $0x8] sm:$0xff]   ;;  %v414_v15 = vld [vmem:[%s556_s5 + $0x10] sm:$0xff]  }
   0x5   :  { %364 = vmatprep.subr.bf16.mxu1 %v420_v0  ;;  %v412_v13 = vld [vmem:[%s556_s5] sm:$0xff]   ;;  %v415_v16 = vld [vmem:[%s556_s5 + $0x18] sm:$0xff]   ;;  %v417_v18 = vld [vmem:[%s556_s5 + $0x28] sm:$0xff]  }
   0x6   :  { %359 = vmatmul.mubr.msk.bf16.vlgmr.msra.gmra.mrb[0].mxu0 %vm37_vm2, %v28_v4  ;;  %v416_v17 = vld [vmem:[%s556_s5 + $0x20] sm:$0xff]   ;;  %v418_v27 = vld [vmem:[%s556_s5 + $0x30] sm:$0xff]   ;;  %v419_v28 = vld [vmem:[%s556_s5 + $0x38] sm:$0xff]  }
   0x7   :  { %398 = vmatprep.mubr.msk.bf16.mxu0 %vm421_vm1, %v420_v0  ;;  %383 = vmatpush3.bf16.msra.mxu0 %v412_v13  ;;  %v316_v19 = vld [vmem:[%s557_s2] ss:$0 sm:$0xff] }
   0x8   :  { %365 = vmatpush3.bf16.msra.mxu1 %v405_v6  ;;  %384 = vmatprep.subr.bf16.mxu0 %v420_v0  ;;  %v318_v29 = vld [vmem:[%s558_s4] ss:$0 sm:$0xff] }
   0x9   :  { %366 = vmatprep.subr.bf16.mxu1 %v420_v0  ;;  %v327_v37 = vld [vmem:[%s559_s6] ss:$0 sm:$0xff] }
   0xb   :  { %385 = vmatpush3.bf16.msra.mxu0 %v413_v14 }
   0xc   :  { %367 = vmatpush3.bf16.msra.mxu1 %v406_v7  ;;  %386 = vmatprep.subr.bf16.mxu0 %v420_v0 }
   0xd   :  { %368 = vmatprep.subr.bf16.mxu1 %v420_v0 }
   0xf   :  { %387 = vmatpush3.bf16.msra.mxu0 %v414_v15 }
  0x10   :  { %369 = vmatpush3.bf16.msra.mxu1 %v407_v8  ;;  %388 = vmatprep.subr.bf16.mxu0 %v420_v0 }
  0x11   :  { %370 = vmatprep.subr.bf16.mxu1 %v420_v0 }
  0x13   :  { %389 = vmatpush3.bf16.msra.mxu0 %v415_v16 }
  0x14   :  { %371 = vmatpush3.bf16.msra.mxu1 %v408_v9  ;;  %390 = vmatprep.subr.bf16.mxu0 %v420_v0 }
  0x15   :  { %372 = vmatprep.subr.bf16.mxu1 %v420_v0 }
  0x17   :  { %391 = vmatpush3.bf16.msra.mxu0 %v416_v17 }
  0x18   :  { %373 = vmatpush3.bf16.msra.mxu1 %v409_v10  ;;  %392 = vmatprep.subr.bf16.mxu0 %v420_v0 }
  0x19   :  { %374 = vmatprep.subr.bf16.mxu1 %v420_v0 }
  0x1b   :  { %393 = vmatpush3.bf16.msra.mxu0 %v417_v18 }
  0x1c   :  { %375 = vmatpush3.bf16.msra.mxu1 %v410_v11  ;;  %394 = vmatprep.subr.bf16.mxu0 %v420_v0 }
  0x1d   :  { %376 = vmatprep.subr.bf16.mxu1 %v420_v0 }
  0x1f   :  { %395 = vmatpush3.bf16.msra.mxu0 %v418_v27 }
  0x20   :  { %377 = vmatpush3.bf16.msra.mxu1 %v411_v12  ;;  %396 = vmatprep.subr.bf16.mxu0 %v420_v0 }
  0x23   :  { %397 = vmatpush3.bf16.msra.mxu0 %v419_v28 }
  0xd9   :  { %v79_v20 = vpop.f32.mrb[0].mxu0 }
  0xda   :  { %v80_v21 = vadd.f32 %v316_v19, %v79_v20  ;;  %v360_v22 = vpop.f32.mrb[1].mxu0 }
  0xdb   :  { %v82_v23 = vpop.f32.mrb[2].mxu0 }
  0xdc   :  { %v85_v24 = vmax.f32 %v80_v21, 0.0  ;;  %v361_v25 = vpop.f32.mrb[3].mxu0 }
  0xde   :  { %v86_v26 = vpack.c.bf16 %v85_v24, %v85_v24 }
  0xe0   :  { %379 = vmatmul.mubr.bf16.vlgmr.msra.gmra.mrb[0].mxu1 %v86_v26 }
 0x1b3   :  { %v192_v30 = vpop.f32.mrb[0].mxu1 }
 0x1b4   :  { %v193_v31 = vadd.f32 %v318_v29, %v192_v30  ;;  %v380_v32 = vpop.f32.mrb[1].mxu1 }
 0x1b5   :  { %v195_v33 = vpop.f32.mrb[2].mxu1 }
 0x1b6   :  { %v198_v34 = vmax.f32 %v193_v31, 0.0  ;;  %v381_v35 = vpop.f32.mrb[3].mxu1 }
 0x1b8   :  { %v199_v36 = vpack.c.bf16 %v198_v34, %v198_v34 }
 0x1ba   :  { %399 = vmatmul.mubr.bf16.vlgmr.msra.gmra.mrb[4].mxu0 %v199_v36 }
 0x28d   :  { %v305_v38 = vpop.f32.mrb[4].mxu0 }
 0x28e   :  { %v306_v39 = vadd.f32 %v327_v37, %v305_v38  ;;  %v400_v40 = vpop.f32.mrb[5].mxu0 }
 0x28f   :  { %v308_v41 = vpop.f32.mrb[6].mxu0 }
 0x290   :  { %311 = vst.msk [vmem:[%s560_s7] sm:$0xff] %vm37_vm2, %v306_v39  ;;  %v401_v42 = vpop.f32.mrb[7].mxu0 }

</bundles_post_ra>
